<compile_context>
chip_gen: v6e
topology: v6e:2x2x1
jax: 0.10.0
libtpu: 0.0.40
codegen_flags: <defaults>
</compile_context>

<pallas_src>
import jax
import jax.numpy as jnp
from jax.experimental import pallas as pl
from jax.experimental.pallas import tpu as pltpu


def _round_up(x, m):
    return ((x + m - 1) // m) * m


def _mlp_kernel(x_ref, w1_ref, b1_ref, w2_ref, b2_ref, o_ref):
    # x_ref: (TM, D), w1_ref: (D, D), b1_ref: (1, D),
    # w2_ref: (D, P), b2_ref: (1, P), o_ref: (TM, P)
    x = x_ref[...]
    h = jnp.dot(x, w1_ref[...], preferred_element_type=jnp.float32) + b1_ref[...]
    h = jnp.maximum(h, 0.0)                                      # ReLU
    out = jnp.dot(h, w2_ref[...], preferred_element_type=jnp.float32) + b2_ref[...]
    o_ref[...] = jnp.tanh(out)                                   # nn.Tanh activation


def _const_spec(shape, single_buffer):
    """BlockSpec for an operand that is identical at every grid step."""
    index_map = lambda i: (0,) * len(shape)
    if single_buffer:
        # Never re-fetched across grid steps -> single buffer halves its VMEM use.
        return pl.BlockSpec(shape, index_map, pipeline_mode=pl.Buffered(1))
    return pl.BlockSpec(shape, index_map)


def param_predictor_forward(x, w1, b1, w2, b2, *, tile_m=512,
                            vmem_limit_bytes=48 * 1024 * 1024):
    """Pallas forward pass.  x: (..., input_dim) -> (..., param_num)."""
    orig_shape = x.shape
    input_dim = orig_shape[-1]
    param_num = w2.shape[1]

    x_flat = x.reshape(-1, input_dim)
    m = x_flat.shape[0]

    # Row tile: as large as allowed (amortize per-step overhead), multiple of 8
    # (sublane), never (much) larger than the row count.
    tile = max(8, min(tile_m, _round_up(m, 8)))
    # v7x has 2 TensorCores: prefer >=2 row blocks once there is enough work.
    if m >= 256 and pl.cdiv(m, tile) < 2:
        tile = max(8, _round_up(pl.cdiv(m, 2), 8))
    grid = (pl.cdiv(m, tile),)

    def run(single_buffer_weights):
        return pl.pallas_call(
            _mlp_kernel,
            out_shape=jax.ShapeDtypeStruct((m, param_num), jnp.float32),
            grid_spec=pltpu.PrefetchScalarGridSpec(
                num_scalar_prefetch=0,
                grid=grid,
                in_specs=[
                    pl.BlockSpec((tile, input_dim), lambda i: (i, 0)),           # x rows
                    _const_spec((input_dim, input_dim), single_buffer_weights),  # W1
                    _const_spec((1, input_dim), single_buffer_weights),          # b1
                    _const_spec((input_dim, param_num), single_buffer_weights),  # W2
                    _const_spec((1, param_num), single_buffer_weights),          # b2
                ],
                out_specs=pl.BlockSpec((tile, param_num), lambda i: (i, 0)),
            ),
            compiler_params=pltpu.CompilerParams(
                dimension_semantics=("parallel",),
                vmem_limit_bytes=vmem_limit_bytes,
            ),
        )(x_flat, w1, b1, w2, b2)

    try:
        out_flat = run(True)
    except Exception:
        # Some Pallas builds reject single-buffered (Buffered(1)) operands;
        # fall back to default double-buffered weights (identical numerics).
        out_flat = run(False)

    return out_flat.reshape(*orig_shape[:-1], param_num)


def init_params(key, input_dim, param_num):
    """Deterministic init mimicking torch.nn.Linear (uniform +-1/sqrt(fan_in))."""
    k1, k2, k3, k4 = jax.random.split(key, 4)
    bound1 = 1.0 / jnp.sqrt(jnp.float32(input_dim))
    w1 = jax.random.uniform(k1, (input_dim, input_dim), jnp.float32, -bound1, bound1)
    b1 = jax.random.uniform(k2, (1, input_dim), jnp.float32, -bound1, bound1)
    bound2 = 1.0 / jnp.sqrt(jnp.float32(input_dim))
    w2 = jax.random.uniform(k3, (input_dim, param_num), jnp.float32, -bound2, bound2)
    b2 = jax.random.uniform(k4, (1, param_num), jnp.float32, -bound2, bound2)
    return w1, b1, w2, b2


def reference_forward(x, w1, b1, w2, b2):
    """Plain-JAX reference for correctness checking."""
    orig_shape = x.shape
    xf = x.reshape(-1, orig_shape[-1])
    h = jnp.maximum(xf @ w1 + b1, 0.0)
    out = jnp.tanh(h @ w2 + b2)
    return out.reshape(*orig_shape[:-1], w2.shape[1])


if __name__ == "__main__":
    key = jax.random.PRNGKey(0)
    kx, kx2, kp = jax.random.split(key, 3)

    batch, seq, input_dim, param_num = 2, 8, 32, 8

    # >2-D input exercises the flatten/unflatten path of the PyTorch forward.
    x = jax.random.normal(kx, (batch, seq, input_dim), dtype=jnp.float32)
    w1, b1, w2, b2 = init_params(kp, input_dim, param_num)

    out = param_predictor_forward(x, w1, b1, w2, b2)
    out = jax.block_until_ready(out)
    ref = reference_forward(x, w1, b1, w2, b2)
    assert out.shape == (batch, seq, param_num), out.shape
    assert jnp.allclose(out, ref, atol=1e-5, rtol=1e-5), "mismatch vs reference"

    # Second check: row count not a multiple of the tile (exercises the
    # masked partial last block + multi-block path introduced by dropping the
    # wrapper pad/slice).
    x2 = jax.random.normal(kx2, (3, 100, input_dim), dtype=jnp.float32)
    out2 = jax.block_until_ready(param_predictor_forward(x2, w1, b1, w2, b2))
    ref2 = reference_forward(x2, w1, b1, w2, b2)
    assert out2.shape == (3, 100, param_num), out2.shape
    assert jnp.allclose(out2, ref2, atol=1e-5, rtol=1e-5), "mismatch vs reference (partial block)"

    print("KERNEL_OK")
</pallas_src>

<mosaic_0001>
module attributes {stable_mosaic.version = 11 : i64} {
  func.func @_mlp_kernel(%arg0: i32, %arg1: memref<16x32xf32, #tpu.memory_space<vmem>>, %arg2: memref<32x32xf32, #tpu.memory_space<vmem>>, %arg3: memref<1x32xf32, #tpu.memory_space<vmem>>, %arg4: memref<32x8xf32, #tpu.memory_space<vmem>>, %arg5: memref<1x8xf32, #tpu.memory_space<vmem>>, %arg6: memref<16x8xf32, #tpu.memory_space<vmem>>) attributes {dimension_semantics = [#tpu.dimension_semantics<parallel>], iteration_bounds = array<i64: 1>, scalar_prefetch = 0 : i64, scratch_operands = 0 : i64, tpu.core_type = #tpu.core_type<tc>, window_params = [{transform_indices = @transform_0, window_bounds = array<i64: 16, 32>}, {pipeline_mode = #tpu.pipeline_mode<synchronous>, transform_indices = @transform_1, window_bounds = array<i64: 32, 32>}, {pipeline_mode = #tpu.pipeline_mode<synchronous>, transform_indices = @transform_2, window_bounds = array<i64: 1, 32>}, {pipeline_mode = #tpu.pipeline_mode<synchronous>, transform_indices = @transform_3, window_bounds = array<i64: 32, 8>}, {pipeline_mode = #tpu.pipeline_mode<synchronous>, transform_indices = @transform_4, window_bounds = array<i64: 1, 8>}, {transform_indices = @transform_5, window_bounds = array<i64: 16, 8>}]} {
    %c0 = arith.constant 0 : index
    %c0_0 = arith.constant 0 : index
    %0 = vector.load %arg1[%c0, %c0_0] : memref<16x32xf32, #tpu.memory_space<vmem>>, vector<16x32xf32>
    %c0_1 = arith.constant 0 : index
    %c0_2 = arith.constant 0 : index
    %1 = vector.load %arg2[%c0_1, %c0_2] : memref<32x32xf32, #tpu.memory_space<vmem>>, vector<32x32xf32>
    %cst = arith.constant dense<0.000000e+00> : vector<16x32xf32>
    %2 = tpu.matmul %0, %1, %cst {dimension_numbers = #tpu.dot_dimension_numbers<[1], [0], [0], [1], [0, 0, 1, 1], [], []>} : vector<16x32xf32>, vector<32x32xf32>, vector<16x32xf32> -> vector<16x32xf32>
    %c0_3 = arith.constant 0 : index
    %c0_4 = arith.constant 0 : index
    %3 = vector.load %arg3[%c0_3, %c0_4] : memref<1x32xf32, #tpu.memory_space<vmem>>, vector<1x32xf32>
    %4 = vector.broadcast %3 : vector<1x32xf32> to vector<16x32xf32>
    %5 = arith.addf %2, %4 : vector<16x32xf32>
    %cst_5 = arith.constant 0.000000e+00 : f32
    %6 = vector.broadcast %cst_5 : f32 to vector<16x32xf32>
    %7 = arith.maximumf %5, %6 : vector<16x32xf32>
    %c0_6 = arith.constant 0 : index
    %c0_7 = arith.constant 0 : index
    %8 = vector.load %arg4[%c0_6, %c0_7] : memref<32x8xf32, #tpu.memory_space<vmem>>, vector<32x8xf32>
    %cst_8 = arith.constant dense<0.000000e+00> : vector<16x8xf32>
    %9 = tpu.matmul %7, %8, %cst_8 {dimension_numbers = #tpu.dot_dimension_numbers<[1], [0], [0], [1], [0, 0, 1, 1], [], []>} : vector<16x32xf32>, vector<32x8xf32>, vector<16x8xf32> -> vector<16x8xf32>
    %c0_9 = arith.constant 0 : index
    %c0_10 = arith.constant 0 : index
    %10 = vector.load %arg5[%c0_9, %c0_10] : memref<1x8xf32, #tpu.memory_space<vmem>>, vector<1x8xf32>
    %11 = vector.broadcast %10 : vector<1x8xf32> to vector<16x8xf32>
    %12 = arith.addf %9, %11 : vector<16x8xf32>
    %13 = math.tanh %12 : vector<16x8xf32>
    %c0_11 = arith.constant 0 : index
    %c0_12 = arith.constant 0 : index
    %14 = vector.load %arg6[%c0_11, %c0_12] : memref<16x8xf32, #tpu.memory_space<vmem>>, vector<16x8xf32>
    tpu.vector_store %arg6[%c0_11, %c0_12], %13 {strides = array<i32>} : memref<16x8xf32, #tpu.memory_space<vmem>>, vector<16x8xf32>,
    return
  }
  func.func @transform_0(%arg0: i32) -> (i32, i32) {
    %c0_i32 = arith.constant 0 : i32
    %c0_i32_0 = arith.constant 0 : i32
    return %arg0, %c0_i32 : i32, i32
  }
  func.func @transform_1(%arg0: i32) -> (i32, i32) {
    %c0_i32 = arith.constant 0 : i32
    %c0_i32_0 = arith.constant 0 : i32
    %c0_i32_1 = arith.constant 0 : i32
    return %c0_i32, %c0_i32_0 : i32, i32
  }
  func.func @transform_2(%arg0: i32) -> (i32, i32) {
    %c0_i32 = arith.constant 0 : i32
    %c0_i32_0 = arith.constant 0 : i32
    %c0_i32_1 = arith.constant 0 : i32
    return %c0_i32, %c0_i32_0 : i32, i32
  }
  func.func @transform_3(%arg0: i32) -> (i32, i32) {
    %c0_i32 = arith.constant 0 : i32
    %c0_i32_0 = arith.constant 0 : i32
    %c0_i32_1 = arith.constant 0 : i32
    return %c0_i32, %c0_i32_0 : i32, i32
  }
  func.func @transform_4(%arg0: i32) -> (i32, i32) {
    %c0_i32 = arith.constant 0 : i32
    %c0_i32_0 = arith.constant 0 : i32
    %c0_i32_1 = arith.constant 0 : i32
    return %c0_i32, %c0_i32_0 : i32, i32
  }
  func.func @transform_5(%arg0: i32) -> (i32, i32) {
    %c0_i32 = arith.constant 0 : i32
    %c0_i32_0 = arith.constant 0 : i32
    return %arg0, %c0_i32 : i32, i32
  }
}

module attributes {stable_mosaic.version = 11 : i64} {
  func.func @_mlp_kernel(%arg0: i32, %arg1: memref<16x32xf32, #tpu.memory_space<vmem>>, %arg2: memref<32x32xf32, #tpu.memory_space<vmem>>, %arg3: memref<1x32xf32, #tpu.memory_space<vmem>>, %arg4: memref<32x8xf32, #tpu.memory_space<vmem>>, %arg5: memref<1x8xf32, #tpu.memory_space<vmem>>, %arg6: memref<16x8xf32, #tpu.memory_space<vmem>>) attributes {dimension_semantics = [#tpu.dimension_semantics<parallel>], iteration_bounds = array<i64: 1>, scalar_prefetch = 0 : i64, scratch_operands = 0 : i64, tpu.core_type = #tpu.core_type<tc>, window_params = [{transform_indices = @transform_0, window_bounds = array<i64: 16, 32>}, {pipeline_mode = #tpu.pipeline_mode<synchronous>, transform_indices = @transform_1, window_bounds = array<i64: 32, 32>}, {pipeline_mode = #tpu.pipeline_mode<synchronous>, transform_indices = @transform_2, window_bounds = array<i64: 1, 32>}, {pipeline_mode = #tpu.pipeline_mode<synchronous>, transform_indices = @transform_3, window_bounds = array<i64: 32, 8>}, {pipeline_mode = #tpu.pipeline_mode<synchronous>, transform_indices = @transform_4, window_bounds = array<i64: 1, 8>}, {transform_indices = @transform_5, window_bounds = array<i64: 16, 8>}]} {
    %c0 = arith.constant 0 : index
    %c0_0 = arith.constant 0 : index
    %0 = vector.load %arg1[%c0, %c0_0] : memref<16x32xf32, #tpu.memory_space<vmem>>, vector<16x32xf32>
    %c0_1 = arith.constant 0 : index
    %c0_2 = arith.constant 0 : index
    %1 = vector.load %arg2[%c0_1, %c0_2] : memref<32x32xf32, #tpu.memory_space<vmem>>, vector<32x32xf32>
    %cst = arith.constant dense<0.000000e+00> : vector<16x32xf32>
    %2 = tpu.matmul %0, %1, %cst {dimension_numbers = #tpu.dot_dimension_numbers<[1], [0], [0], [1], [0, 0, 1, 1], [], []>} : vector<16x32xf32>, vector<32x32xf32>, vector<16x32xf32> -> vector<16x32xf32>
    %c0_3 = arith.constant 0 : index
    %c0_4 = arith.constant 0 : index
    %3 = vector.load %arg3[%c0_3, %c0_4] : memref<1x32xf32, #tpu.memory_space<vmem>>, vector<1x32xf32>
    %4 = vector.broadcast %3 : vector<1x32xf32> to vector<16x32xf32>
    %5 = arith.addf %2, %4 : vector<16x32xf32>
    %cst_5 = arith.constant 0.000000e+00 : f32
    %6 = vector.broadcast %cst_5 : f32 to vector<16x32xf32>
    %7 = arith.maximumf %5, %6 : vector<16x32xf32>
    %c0_6 = arith.constant 0 : index
    %c0_7 = arith.constant 0 : index
    %8 = vector.load %arg4[%c0_6, %c0_7] : memref<32x8xf32, #tpu.memory_space<vmem>>, vector<32x8xf32>
    %cst_8 = arith.constant dense<0.000000e+00> : vector<16x8xf32>
    %9 = tpu.matmul %7, %8, %cst_8 {dimension_numbers = #tpu.dot_dimension_numbers<[1], [0], [0], [1], [0, 0, 1, 1], [], []>} : vector<16x32xf32>, vector<32x8xf32>, vector<16x8xf32> -> vector<16x8xf32>
    %c0_9 = arith.constant 0 : index
    %c0_10 = arith.constant 0 : index
    %10 = vector.load %arg5[%c0_9, %c0_10] : memref<1x8xf32, #tpu.memory_space<vmem>>, vector<1x8xf32>
    %11 = vector.broadcast %10 : vector<1x8xf32> to vector<16x8xf32>
    %12 = arith.addf %9, %11 : vector<16x8xf32>
    %13 = math.tanh %12 : vector<16x8xf32>
    %c0_11 = arith.constant 0 : index
    %c0_12 = arith.constant 0 : index
    %14 = vector.load %arg6[%c0_11, %c0_12] : memref<16x8xf32, #tpu.memory_space<vmem>>, vector<16x8xf32>
    tpu.vector_store %arg6[%c0_11, %c0_12], %13 {strides = array<i32>} : memref<16x8xf32, #tpu.memory_space<vmem>>, vector<16x8xf32>,
    return
  }
  func.func @transform_0(%arg0: i32) -> (i32, i32) {
    %c0_i32 = arith.constant 0 : i32
    %c0_i32_0 = arith.constant 0 : i32
    return %arg0, %c0_i32 : i32, i32
  }
  func.func @transform_1(%arg0: i32) -> (i32, i32) {
    %c0_i32 = arith.constant 0 : i32
    %c0_i32_0 = arith.constant 0 : i32
    %c0_i32_1 = arith.constant 0 : i32
    return %c0_i32, %c0_i32_0 : i32, i32
  }
  func.func @transform_2(%arg0: i32) -> (i32, i32) {
    %c0_i32 = arith.constant 0 : i32
    %c0_i32_0 = arith.constant 0 : i32
    %c0_i32_1 = arith.constant 0 : i32
    return %c0_i32, %c0_i32_0 : i32, i32
  }
  func.func @transform_3(%arg0: i32) -> (i32, i32) {
    %c0_i32 = arith.constant 0 : i32
    %c0_i32_0 = arith.constant 0 : i32
    %c0_i32_1 = arith.constant 0 : i32
    return %c0_i32, %c0_i32_0 : i32, i32
  }
  func.func @transform_4(%arg0: i32) -> (i32, i32) {
    %c0_i32 = arith.constant 0 : i32
    %c0_i32_0 = arith.constant 0 : i32
    %c0_i32_1 = arith.constant 0 : i32
    return %c0_i32, %c0_i32_0 : i32, i32
  }
  func.func @transform_5(%arg0: i32) -> (i32, i32) {
    %c0_i32 = arith.constant 0 : i32
    %c0_i32_0 = arith.constant 0 : i32
    return %arg0, %c0_i32 : i32, i32
  }
}

</mosaic_0001>

<bundles_post_ra>
// kernel: tpu_custom_call.1
= control target key start
LH: loop header
LB: loop body
LE: loop exit
PB: predicated region body
PF: predicated region fallthrough
CT: control target
= control target key end

     0   :  { %10 = vsyncpa [#allocation3], 0  ;;  %s302_s18 = smov [#allocation2]   ;;  %s378_s0 = inlined_call_operand.hbm [shape: f32[16,32], index: 0, kind: input, shape index: {}]   ;;  %s379_s1 = inlined_call_operand.vmem [shape: f32[32,32], index: 1, kind: input, shape index: {}]   ;;  %s380_s2 = inlined_call_operand.vmem [shape: f32[1,32], index: 2, kind: input, shape index: {}]   ;;  %s381_s3 = inlined_call_operand.vmem [shape: f32[32,8], index: 3, kind: input, shape index: {}]   ;;  %s382_s4 = inlined_call_operand.vmem [shape: f32[1,8], index: 4, kind: input, shape index: {}]   ;;  %s383_s5 = inlined_call_operand.vmem [shape: f32[16,8], index: 5, kind: output, shape index: {}]  }
   0x1   :  { %s16_s19 = sshll.u32 %s302_s18, 4  ;;  %s17_s19 = int_to_ptr.vmem [resolvable:$true] %s16_s19 }
   0x2   :  { %s288_s20 = scalar_lea.vmem %s17_s19, 256  ;;  %p293_p1 = scmp.lt.s32.totalorder %s17_s19, %s17_s19 }
   0x3   :  { %p289_p0 = scmp.ne.s32.totalorder %s17_s19, %s288_s20  ;;  %p294_p2 = scmp.lt.s32.totalorder %s288_s20, %s288_s20 }
   0x5   :  { %p295_p3 = por %p294_p2, %p293_p1 }
   0x7   :  { %p296_p4 = pnand %p295_p3, %p289_p0 }
   0x9   :  { %299 = shalt.err (!%p296_p4)
}
   0xa   :  { %s303_s21 = smov 128   ;;  %s304_s22 = smov 8  }
   0xb   :  { %22 = dma.hbm_to_vmem [thread:$0]  %s378_s0, 256, %s17_s19, [#allocation3], %s303_s21, %s303_s21, %s304_s22  }
   0xc   :  { %300 = dma.done.wait [#allocation3], 256  }
   0xd   :  { %301 = vsyncadd [#allocation3], 4294967040  ;;  %vm47_vm0 = vcmask 261120   ;;  %v39_v0 = vld [vmem:[%s379_s1 + $0x18] sm:$0xff]  ;;  %v38_v1 = vld [vmem:[%s379_s1 + $0x10] sm:$0xff]  ;;  %vm225_vm1 = vcmask 64512  }
   0xe   :  { %251 = vmatprep.subr.mxu0 %v39_v0  ;;  %v34_v2 = vld [vmem:[#allocation2] sm:$0xff]  ;;  %v37_v3 = vld [vmem:[%s379_s1 + $0x8] sm:$0xff]  ;;  %v134_v6 = vld [vmem:[%s381_s3 + $0x18] sm:$0xff] }
   0xf   :  { %252 = vmatpush3.msra.mxu0 %v39_v0  ;;  %259 = vmatprep.mubr.msk.f32.mxu0 %vm47_vm0, %v34_v2  ;;  %v36_v4 = vld [vmem:[%s379_s1] sm:$0xff]  ;;  %v35_v5 = vld [vmem:[#allocation2 + $0x8] sm:$0xff]  ;;  %v133_v7 = vld [vmem:[%s381_s3 + $0x10] sm:$0xff] }
  0x10   :  { %253 = vmatprep.subr.mxu0 %v38_v1  ;;  %262 = vmatprep.subr.mxu1 %v134_v6  ;;  %v132_v8 = vld [vmem:[%s381_s3 + $0x8] sm:$0xff]  ;;  %v131_v9 = vld [vmem:[%s381_s3] sm:$0xff] }
  0x11   :  { %254 = vmatpush3.msra.mxu0 %v38_v1  ;;  %263 = vmatpush3.msra.mxu1 %v134_v6  ;;  %v233_v10 = vld [vmem:[%s380_s2] ss:$0 sm:$0xff] }
  0x12   :  { %255 = vmatprep.subr.mxu0 %v37_v3  ;;  %264 = vmatprep.subr.mxu1 %v133_v7  ;;  %v236_v17 = vld [vmem:[%s382_s4] ss:$0 sm:$0xff] }
  0x13   :  { %256 = vmatpush3.msra.mxu0 %v37_v3  ;;  %265 = vmatpush3.msra.mxu1 %v133_v7 }
  0x14   :  { %257 = vmatprep.subr.mxu0 %v36_v4  ;;  %266 = vmatprep.subr.mxu1 %v132_v8 }
  0x15   :  { %258 = vmatpush3.msra.mxu0 %v36_v4  ;;  %267 = vmatpush3.msra.mxu1 %v132_v8 }
  0x16   :  { %260 = vmatmul.mubr.msk.f32.vlgmr.msra.gmra.mxu0 %vm47_vm0, %v35_v5  ;;  %268 = vmatprep.subr.mxu1 %v131_v9 }
  0x17   :  { %269 = vmatpush3.msra.mxu1 %v131_v9 }
  0xd6   :  { %v261_v11 = vpop.f32.mrf.mxu0 }
  0xd7   :  { %v126_v12 = vadd.f32 %v261_v11, %v233_v10 }
  0xd8   :  { %v120_v13 = vpop.f32.mrf.mxu0 }
  0xd9   :  { %v121_v14 = vadd.f32 %v233_v10, %v120_v13  ;;  %v130_v16 = vmax.f32 %v126_v12, 0.0 }
  0xdb   :  { %v129_v15 = vmax.f32 %v121_v14, 0.0 }
  0xdd   :  { %270 = vmatprep.mubr.msk.f32.mxu1 %vm47_vm0, %v129_v15 }
  0xde   :  { %271 = vmatmul.mubr.msk.f32.vlgmr.msra.gmra.mxu1 %vm47_vm0, %v130_v16 }
 0x19e   :  { %v272_v18 = vpop.f32.mrf.mxu1 }
 0x19f   :  { %v220_v19 = vadd.f32 %v272_v18, %v236_v17 }
 0x1a0   :  { %v214_v20 = vpop.f32.mrf.mxu1 }
 0x1a1   :  { %276 = vtanh.f32 %v220_v19  ;;  %v215_v21 = vadd.f32 %v236_v17, %v214_v20 }
 0x1a3   :  { %278 = vtanh.f32 %v215_v21 }
 0x1ae   :  { %v277_v22 = vpop.eup %276 }
 0x1af   :  { %227 = vst.msk [vmem:[%s383_s5 + $0x8] sm:$0xff] %vm225_vm1, %v277_v22 }
 0x1b0   :  { %v279_v23 = vpop.eup %278 }
 0x1b1   :  { %226 = vst.msk [vmem:[%s383_s5] sm:$0xff] %vm225_vm1, %v279_v23 }
 0x1b2   :  { %232 = vsyncpa [#allocation3], 1 }

// kernel: tpu_custom_call.1
= control target key start
LH: loop header
LB: loop body
LE: loop exit
PB: predicated region body
PF: predicated region fallthrough
CT: control target
= control target key end

     0   :  { %10 = vsyncpa [#allocation3], 0  ;;  %s302_s18 = smov [#allocation2]   ;;  %s378_s0 = inlined_call_operand.hbm [shape: f32[16,32], index: 0, kind: input, shape index: {}]   ;;  %s379_s1 = inlined_call_operand.vmem [shape: f32[32,32], index: 1, kind: input, shape index: {}]   ;;  %s380_s2 = inlined_call_operand.vmem [shape: f32[1,32], index: 2, kind: input, shape index: {}]   ;;  %s381_s3 = inlined_call_operand.vmem [shape: f32[32,8], index: 3, kind: input, shape index: {}]   ;;  %s382_s4 = inlined_call_operand.vmem [shape: f32[1,8], index: 4, kind: input, shape index: {}]   ;;  %s383_s5 = inlined_call_operand.vmem [shape: f32[16,8], index: 5, kind: output, shape index: {}]  }
   0x1   :  { %s16_s19 = sshll.u32 %s302_s18, 4  ;;  %s17_s19 = int_to_ptr.vmem [resolvable:$true] %s16_s19 }
   0x2   :  { %s288_s20 = scalar_lea.vmem %s17_s19, 256  ;;  %p293_p1 = scmp.lt.s32.totalorder %s17_s19, %s17_s19 }
   0x3   :  { %p289_p0 = scmp.ne.s32.totalorder %s17_s19, %s288_s20  ;;  %p294_p2 = scmp.lt.s32.totalorder %s288_s20, %s288_s20 }
   0x5   :  { %p295_p3 = por %p294_p2, %p293_p1 }
   0x7   :  { %p296_p4 = pnand %p295_p3, %p289_p0 }
   0x9   :  { %299 = shalt.err (!%p296_p4)
}
   0xa   :  { %s303_s21 = smov 128   ;;  %s304_s22 = smov 8  }
   0xb   :  { %22 = dma.hbm_to_vmem [thread:$0]  %s378_s0, 256, %s17_s19, [#allocation3], %s303_s21, %s303_s21, %s304_s22  }
   0xc   :  { %300 = dma.done.wait [#allocation3], 256  }
   0xd   :  { %301 = vsyncadd [#allocation3], 4294967040  ;;  %vm47_vm0 = vcmask 261120   ;;  %v39_v0 = vld [vmem:[%s379_s1 + $0x18] sm:$0xff]  ;;  %v38_v1 = vld [vmem:[%s379_s1 + $0x10] sm:$0xff]  ;;  %vm225_vm1 = vcmask 64512  }
   0xe   :  { %251 = vmatprep.subr.mxu0 %v39_v0  ;;  %v34_v2 = vld [vmem:[#allocation2] sm:$0xff]  ;;  %v37_v3 = vld [vmem:[%s379_s1 + $0x8] sm:$0xff]  ;;  %v134_v6 = vld [vmem:[%s381_s3 + $0x18] sm:$0xff] }
   0xf   :  { %252 = vmatpush3.msra.mxu0 %v39_v0  ;;  %259 = vmatprep.mubr.msk.f32.mxu0 %vm47_vm0, %v34_v2  ;;  %v36_v4 = vld [vmem:[%s379_s1] sm:$0xff]  ;;  %v35_v5 = vld [vmem:[#allocation2 + $0x8] sm:$0xff]  ;;  %v133_v7 = vld [vmem:[%s381_s3 + $0x10] sm:$0xff] }
  0x10   :  { %253 = vmatprep.subr.mxu0 %v38_v1  ;;  %262 = vmatprep.subr.mxu1 %v134_v6  ;;  %v132_v8 = vld [vmem:[%s381_s3 + $0x8] sm:$0xff]  ;;  %v131_v9 = vld [vmem:[%s381_s3] sm:$0xff] }
  0x11   :  { %254 = vmatpush3.msra.mxu0 %v38_v1  ;;  %263 = vmatpush3.msra.mxu1 %v134_v6  ;;  %v233_v10 = vld [vmem:[%s380_s2] ss:$0 sm:$0xff] }
  0x12   :  { %255 = vmatprep.subr.mxu0 %v37_v3  ;;  %264 = vmatprep.subr.mxu1 %v133_v7  ;;  %v236_v17 = vld [vmem:[%s382_s4] ss:$0 sm:$0xff] }
  0x13   :  { %256 = vmatpush3.msra.mxu0 %v37_v3  ;;  %265 = vmatpush3.msra.mxu1 %v133_v7 }
  0x14   :  { %257 = vmatprep.subr.mxu0 %v36_v4  ;;  %266 = vmatprep.subr.mxu1 %v132_v8 }
  0x15   :  { %258 = vmatpush3.msra.mxu0 %v36_v4  ;;  %267 = vmatpush3.msra.mxu1 %v132_v8 }
  0x16   :  { %260 = vmatmul.mubr.msk.f32.vlgmr.msra.gmra.mxu0 %vm47_vm0, %v35_v5  ;;  %268 = vmatprep.subr.mxu1 %v131_v9 }
  0x17   :  { %269 = vmatpush3.msra.mxu1 %v131_v9 }
  0xd6   :  { %v261_v11 = vpop.f32.mrf.mxu0 }
  0xd7   :  { %v126_v12 = vadd.f32 %v261_v11, %v233_v10 }
  0xd8   :  { %v120_v13 = vpop.f32.mrf.mxu0 }
  0xd9   :  { %v121_v14 = vadd.f32 %v233_v10, %v120_v13  ;;  %v130_v16 = vmax.f32 %v126_v12, 0.0 }
  0xdb   :  { %v129_v15 = vmax.f32 %v121_v14, 0.0 }
  0xdd   :  { %270 = vmatprep.mubr.msk.f32.mxu1 %vm47_vm0, %v129_v15 }
  0xde   :  { %271 = vmatmul.mubr.msk.f32.vlgmr.msra.gmra.mxu1 %vm47_vm0, %v130_v16 }
 0x19e   :  { %v272_v18 = vpop.f32.mrf.mxu1 }
 0x19f   :  { %v220_v19 = vadd.f32 %v272_v18, %v236_v17 }
 0x1a0   :  { %v214_v20 = vpop.f32.mrf.mxu1 }
 0x1a1   :  { %276 = vtanh.f32 %v220_v19  ;;  %v215_v21 = vadd.f32 %v236_v17, %v214_v20 }
 0x1a3   :  { %278 = vtanh.f32 %v215_v21 }
 0x1ae   :  { %v277_v22 = vpop.eup %276 }
 0x1af   :  { %227 = vst.msk [vmem:[%s383_s5 + $0x8] sm:$0xff] %vm225_vm1, %v277_v22 }
 0x1b0   :  { %v279_v23 = vpop.eup %278 }
 0x1b1   :  { %226 = vst.msk [vmem:[%s383_s5] sm:$0xff] %vm225_vm1, %v279_v23 }
 0x1b2   :  { %232 = vsyncpa [#allocation3], 1 }

</bundles_post_ra>
